<compile_context>
chip_gen: v7x
topology: tpu7x:2x2x1
jax: 0.10.0
libtpu: 0.0.40
codegen_flags: <defaults>
</compile_context>

<pallas_src>
import functools

import jax
import jax.numpy as jnp
from jax.experimental import pallas as pl
from jax.experimental.pallas import tpu as pltpu

NEG_SLOPE = 0.01
LANE = 128
SUBLANE = 8


def _leaky_relu(x):
    # For 0 < slope < 1, max(x, slope*x) == leaky_relu(x): single VALU op.
    return jnp.maximum(x, NEG_SLOPE * x)


def _round_up(n, m):
    return (n + m - 1) // m * m


def box_encoder_kernel(x_ref, wc_ref, bc_ref, w2_ref, o_ref, *, h_pad):
    x = x_ref[...]                                            # (tb, in_size)

    # Fused shared-LHS matmul:  x @ [W1 | Wskip]  -> (tb, H_pad + F_pad).
    # bc already contains [b1 | (bskip + b2)].
    z = jnp.dot(x, wc_ref[...], preferred_element_type=jnp.float32) + bc_ref[...]

    h1 = _leaky_relu(z[:, :h_pad])                            # (tb, H_pad)  lane-aligned slice
    skip = z[:, h_pad:]                                       # (tb, F_pad)  lane-aligned slice

    out = _leaky_relu(
        skip
        + jnp.dot(h1.astype(w2_ref.dtype), w2_ref[...],
                  preferred_element_type=jnp.float32)
    )                                                         # (tb, F_pad)

    o_ref[...] = out.astype(o_ref.dtype)


def box_encoder_forward(x, params, *, compute_dtype=jnp.float32, max_tb=256):
    """x: (B, in_size) float32.

    params use the PyTorch nn.Linear convention (weight shape = (out, in)):
      mlp1_w (H, in), mlp1_b (H,), mlp2_w (F, H), mlp2_b (F,),
      skip_w (F, in), skip_b (F,).

    compute_dtype: jnp.bfloat16 recommended on v6e/v7x (f32 accumulation kept).
    """
    B, in_size = x.shape
    H = params["mlp1_w"].shape[0]
    F_out = params["skip_w"].shape[0]

    # Pad matmul-N / output lane dims to 128 (lane-dense matmuls, unmasked
    # stores); pad the batch to a sublane-aligned tile.
    H_p = _round_up(H, LANE)
    Fo_p = _round_up(F_out, LANE)
    tb = min(_round_up(B, SUBLANE), max_tb)
    B_p = _round_up(B, tb)

    f32 = jnp.float32

    # Fused [W1 | Wskip] along the output axis (shared LHS x): (in, H_p + Fo_p).
    w1 = jnp.zeros((in_size, H_p), compute_dtype).at[:, :H].set(
        params["mlp1_w"].T.astype(compute_dtype))
    ws = jnp.zeros((in_size, Fo_p), compute_dtype).at[:, :F_out].set(
        params["skip_w"].T.astype(compute_dtype))
    wc = jnp.concatenate([w1, ws], axis=1)

    # Fused bias row: [b1 | (bskip + b2)] -- mlp2's bias is added at the same
    # point as the skip bias, so fold it in here and drop b2 from the kernel.
    bc = jnp.zeros((1, H_p + Fo_p), f32)
    bc = bc.at[0, :H].set(params["mlp1_b"].astype(f32))
    bc = bc.at[0, H_p:H_p + F_out].set(
        params["skip_b"].astype(f32) + params["mlp2_b"].astype(f32))

    w2 = jnp.zeros((H_p, Fo_p), compute_dtype).at[:H, :F_out].set(
        params["mlp2_w"].T.astype(compute_dtype))

    x_p = jnp.zeros((B_p, in_size), compute_dtype).at[:B, :].set(
        x.astype(compute_dtype))

    grid = (B_p // tb,)
    resident = lambda shape: pl.BlockSpec(shape, lambda i: (0, 0))

    out_p = pl.pallas_call(
        functools.partial(box_encoder_kernel, h_pad=H_p),
        out_shape=jax.ShapeDtypeStruct((B_p, Fo_p), x.dtype),
        grid_spec=pltpu.PrefetchScalarGridSpec(
            num_scalar_prefetch=0,
            grid=grid,
            in_specs=[
                pl.BlockSpec((tb, in_size), lambda i: (i, 0)),  # x tile
                resident((in_size, H_p + Fo_p)),                # [W1 | Wskip]
                resident((1, H_p + Fo_p)),                      # [b1 | bskip+b2]
                resident((H_p, Fo_p)),                          # W2
            ],
            out_specs=pl.BlockSpec((tb, Fo_p), lambda i: (i, 0)),
        ),
        compiler_params=pltpu.CompilerParams(
            dimension_semantics=("parallel",)),
    )(x_p, wc, bc, w2)

    return out_p[:B, :F_out]


def box_encoder_reference(x, params):
    """Pure-JAX reference mirroring the PyTorch forward."""
    def linear(v, w, b):
        return v @ w.T + b
    h1 = jax.nn.leaky_relu(linear(x, params["mlp1_w"], params["mlp1_b"]), NEG_SLOPE)
    return jax.nn.leaky_relu(
        linear(x, params["skip_w"], params["skip_b"])
        + linear(h1, params["mlp2_w"], params["mlp2_b"]),
        NEG_SLOPE,
    )


def init_params(key, in_size, feature_size, hidden_size):
    """Deterministic init; weights use the PyTorch nn.Linear (out, in) layout."""
    ks = jax.random.split(key, 6)
    def lin(kw, kb, out_f, in_f):
        bound = 1.0 / jnp.sqrt(in_f)
        w = jax.random.uniform(kw, (out_f, in_f), jnp.float32, -bound, bound)
        b = jax.random.uniform(kb, (out_f,), jnp.float32, -bound, bound)
        return w, b
    p = {}
    p["skip_w"], p["skip_b"] = lin(ks[0], ks[1], feature_size, in_size)
    p["mlp1_w"], p["mlp1_b"] = lin(ks[2], ks[3], hidden_size, in_size)
    p["mlp2_w"], p["mlp2_b"] = lin(ks[4], ks[5], feature_size, hidden_size)
    return p


if __name__ == "__main__":
    key = jax.random.PRNGKey(0)
    k_params, k_x = jax.random.split(key)

    in_size = 12
    feature_size = 32
    hidden_size = 64
    batch = 16

    params = init_params(k_params, in_size, feature_size, hidden_size)
    x = jax.random.normal(k_x, (batch, in_size), jnp.float32)

    out = box_encoder_forward(x, params)          # f32 path (tight check)
    out = jax.block_until_ready(out)

    ref = box_encoder_reference(x, params)
    assert out.shape == (batch, feature_size)
    assert jnp.allclose(out, ref, atol=2e-5, rtol=2e-5), "mismatch vs reference"

    print("KERNEL_OK")
</pallas_src>

<mosaic_0001>
module attributes {stable_mosaic.version = 11 : i64} {
  func.func @box_encoder_kernel(%arg0: i32, %arg1: memref<16x12xf32, #tpu.memory_space<vmem>>, %arg2: memref<12x256xf32, #tpu.memory_space<vmem>>, %arg3: memref<1x256xf32, #tpu.memory_space<vmem>>, %arg4: memref<128x128xf32, #tpu.memory_space<vmem>>, %arg5: memref<16x128xf32, #tpu.memory_space<vmem>>) attributes {dimension_semantics = [#tpu.dimension_semantics<parallel>], iteration_bounds = array<i64: 1>, scalar_prefetch = 0 : i64, scratch_operands = 0 : i64, tpu.core_type = #tpu.core_type<tc>, window_params = [{transform_indices = @transform_0, window_bounds = array<i64: 16, 12>}, {pipeline_mode = #tpu.pipeline_mode<synchronous>, transform_indices = @transform_1, window_bounds = array<i64: 12, 256>}, {pipeline_mode = #tpu.pipeline_mode<synchronous>, transform_indices = @transform_2, window_bounds = array<i64: 1, 256>}, {pipeline_mode = #tpu.pipeline_mode<synchronous>, transform_indices = @transform_3, window_bounds = array<i64: 128, 128>}, {transform_indices = @transform_4, window_bounds = array<i64: 16, 128>}]} {
    %c0 = arith.constant 0 : index
    %c0_0 = arith.constant 0 : index
    %0 = vector.load %arg1[%c0, %c0_0] : memref<16x12xf32, #tpu.memory_space<vmem>>, vector<16x12xf32>
    %c0_1 = arith.constant 0 : index
    %c0_2 = arith.constant 0 : index
    %1 = vector.load %arg2[%c0_1, %c0_2] : memref<12x256xf32, #tpu.memory_space<vmem>>, vector<12x256xf32>
    %cst = arith.constant dense<0.000000e+00> : vector<16x256xf32>
    %2 = tpu.matmul %0, %1, %cst {dimension_numbers = #tpu.dot_dimension_numbers<[1], [0], [0], [1], [0, 0, 1, 1], [], []>} : vector<16x12xf32>, vector<12x256xf32>, vector<16x256xf32> -> vector<16x256xf32>
    %c0_3 = arith.constant 0 : index
    %c0_4 = arith.constant 0 : index
    %3 = vector.load %arg3[%c0_3, %c0_4] : memref<1x256xf32, #tpu.memory_space<vmem>>, vector<1x256xf32>
    %4 = vector.broadcast %3 : vector<1x256xf32> to vector<16x256xf32>
    %5 = arith.addf %2, %4 : vector<16x256xf32>
    %6 = vector.extract_strided_slice %5 {offsets = [0, 0], sizes = [16, 128], strides = [1, 1]} : vector<16x256xf32> to vector<16x128xf32>
    %cst_5 = arith.constant 0.00999999977 : f32
    %7 = vector.broadcast %cst_5 : f32 to vector<16x128xf32>
    %8 = arith.mulf %7, %6 : vector<16x128xf32>
    %9 = arith.maximumf %6, %8 : vector<16x128xf32>
    %10 = vector.extract_strided_slice %5 {offsets = [0, 128], sizes = [16, 128], strides = [1, 1]} : vector<16x256xf32> to vector<16x128xf32>
    %c0_6 = arith.constant 0 : index
    %c0_7 = arith.constant 0 : index
    %11 = vector.load %arg4[%c0_6, %c0_7] : memref<128x128xf32, #tpu.memory_space<vmem>>, vector<128x128xf32>
    %cst_8 = arith.constant dense<0.000000e+00> : vector<16x128xf32>
    %12 = tpu.matmul %9, %11, %cst_8 {dimension_numbers = #tpu.dot_dimension_numbers<[1], [0], [0], [1], [0, 0, 1, 1], [], []>} : vector<16x128xf32>, vector<128x128xf32>, vector<16x128xf32> -> vector<16x128xf32>
    %13 = arith.addf %10, %12 : vector<16x128xf32>
    %cst_9 = arith.constant 0.00999999977 : f32
    %14 = vector.broadcast %cst_9 : f32 to vector<16x128xf32>
    %15 = arith.mulf %14, %13 : vector<16x128xf32>
    %16 = arith.maximumf %13, %15 : vector<16x128xf32>
    %c0_10 = arith.constant 0 : index
    %c0_11 = arith.constant 0 : index
    %17 = vector.load %arg5[%c0_10, %c0_11] : memref<16x128xf32, #tpu.memory_space<vmem>>, vector<16x128xf32>
    tpu.vector_store %arg5[%c0_10, %c0_11], %16 {strides = array<i32>} : memref<16x128xf32, #tpu.memory_space<vmem>>, vector<16x128xf32>,
    return
  }
  func.func @transform_0(%arg0: i32) -> (i32, i32) {
    %c0_i32 = arith.constant 0 : i32
    %c0_i32_0 = arith.constant 0 : i32
    return %arg0, %c0_i32 : i32, i32
  }
  func.func @transform_1(%arg0: i32) -> (i32, i32) {
    %c0_i32 = arith.constant 0 : i32
    %c0_i32_0 = arith.constant 0 : i32
    %c0_i32_1 = arith.constant 0 : i32
    return %c0_i32, %c0_i32_0 : i32, i32
  }
  func.func @transform_2(%arg0: i32) -> (i32, i32) {
    %c0_i32 = arith.constant 0 : i32
    %c0_i32_0 = arith.constant 0 : i32
    %c0_i32_1 = arith.constant 0 : i32
    return %c0_i32, %c0_i32_0 : i32, i32
  }
  func.func @transform_3(%arg0: i32) -> (i32, i32) {
    %c0_i32 = arith.constant 0 : i32
    %c0_i32_0 = arith.constant 0 : i32
    %c0_i32_1 = arith.constant 0 : i32
    return %c0_i32, %c0_i32_0 : i32, i32
  }
  func.func @transform_4(%arg0: i32) -> (i32, i32) {
    %c0_i32 = arith.constant 0 : i32
    %c0_i32_0 = arith.constant 0 : i32
    return %arg0, %c0_i32 : i32, i32
  }
}

</mosaic_0001>

<bundles_post_ra>
// kernel: tpu_custom_call.1
= control target key start
LH: loop header
LB: loop body
LE: loop exit
PB: predicated region body
PF: predicated region fallthrough
CT: control target
= control target key end

     0   :  { %9 = vsyncpa [#allocation3], 0  ;;  %s583_s0 = inlined_call_operand.hbm [shape: f32[16,12], index: 0, kind: input, shape index: {}]   ;;  %s584_s1 = inlined_call_operand.hbm [shape: f32[12,256], index: 1, kind: input, shape index: {}]   ;;  %s585_s2 = inlined_call_operand.vmem [shape: f32[1,256], index: 2, kind: input, shape index: {}]   ;;  %s586_s3 = inlined_call_operand.hbm [shape: f32[128,128], index: 3, kind: input, shape index: {}]   ;;  %s587_s4 = inlined_call_operand.hbm [shape: f32[16,128], index: 4, kind: output, shape index: {}]  }
   0x1   :  { %10 = vsyncpa [#allocation6], 0 }
   0x2   :  { %11 = vsyncpa [#allocation4], 0  ;;  %s488_s15 = smov [#allocation5]   ;;  %s394_s19 = scalar_lea.hbm %s584_s1, 512 }
   0x3   :  { %s29_s16 = sshll.u32 %s488_s15, 4  ;;  %p395_p0 = scmp.ne.s32.totalorder %s584_s1, %s394_s19  ;;  %s30_s16 = int_to_ptr.vmem [resolvable:$true] %s29_s16 }
   0x4   :  { %p398_p1 = scmp.lt.u32.totalorder %s394_s19, %s584_s1 }
   0x6   :  { %p400_p2 = pnand %p398_p1, %p395_p0 }
   0x8   :  { %403 = shalt.err (!%p400_p2)
}
   0x9   :  { %s404_s24 = scalar_lea.vmem %s30_s16, 512  ;;  %p409_p4 = scmp.lt.s32.totalorder %s30_s16, %s30_s16 }
   0xa   :  { %p405_p3 = scmp.ne.s32.totalorder %s30_s16, %s404_s24  ;;  %p410_p5 = scmp.lt.s32.totalorder %s404_s24, %s404_s24 }
   0xc   :  { %p411_p6 = por %p410_p5, %p409_p4 }
   0xe   :  { %p412_p7 = pnand %p411_p6, %p405_p3 }
  0x10   :  { %415 = shalt.err (!%p412_p7)
}
  0x11   :  { %s489_s25 = smov 256   ;;  %s490_s26 = smov 16  }
  0x12   :  { %35 = dma.hbm_to_vmem [thread:$0]  %s584_s1, 512, %s30_s16, [#allocation6], %s489_s25, %s489_s25, %s490_s26  }
  0x13   :  { %s491_s29 = smov [#allocation2]   ;;  %s416_s7 = scalar_lea.hbm %s583_s0, 256 }
  0x14   :  { %s17_s30 = sshll.u32 %s491_s29, 4  ;;  %p417_p8 = scmp.ne.s32.totalorder %s583_s0, %s416_s7  ;;  %s18_s30 = int_to_ptr.vmem [resolvable:$true] %s17_s30 }
  0x15   :  { %p420_p9 = scmp.lt.u32.totalorder %s416_s7, %s583_s0 }
  0x17   :  { %p422_p10 = pnand %p420_p9, %p417_p8 }
  0x19   :  { %425 = shalt.err (!%p422_p10)
}
  0x1a   :  { %s426_s12 = scalar_lea.vmem %s18_s30, 256  ;;  %p431_p12 = scmp.lt.s32.totalorder %s18_s30, %s18_s30 }
  0x1b   :  { %p427_p11 = scmp.ne.s32.totalorder %s18_s30, %s426_s12  ;;  %p432_p13 = scmp.lt.s32.totalorder %s426_s12, %s426_s12 }
  0x1d   :  { %p433_p0 = por %p432_p13, %p431_p12 }
  0x1f   :  { %p434_p1 = pnand %p433_p0, %p427_p11 }
  0x21   :  { %437 = shalt.err (!%p434_p1)
}
  0x22   :  { %s492_s1 = smov 128   ;;  %s493_s13 = smov 8  }
  0x23   :  { %23 = dma.hbm_to_vmem [thread:$0]  %s583_s0, 256, %s18_s30, [#allocation3], %s492_s1, %s492_s1, %s493_s13  }
  0x24   :  { %s494_s16 = smov [#allocation7]   ;;  %s438_s20 = scalar_lea.hbm %s586_s3, 2048 }
  0x25   :  { %s43_s17 = sshll.u32 %s494_s16, 4  ;;  %p439_p2 = scmp.ne.s32.totalorder %s586_s3, %s438_s20  ;;  %s44_s17 = int_to_ptr.vmem [resolvable:$true] %s43_s17 }
  0x26   :  { %p442_p3 = scmp.lt.u32.totalorder %s438_s20, %s586_s3 }
  0x28   :  { %p444_p4 = pnand %p442_p3, %p439_p2 }
  0x2a   :  { %447 = shalt.err (!%p444_p4)
}
  0x2b   :  { %s448_s25 = scalar_lea.vmem %s44_s17, 2048  ;;  %p453_p6 = scmp.lt.s32.totalorder %s44_s17, %s44_s17 }
  0x2c   :  { %p449_p5 = scmp.ne.s32.totalorder %s44_s17, %s448_s25  ;;  %p454_p7 = scmp.lt.s32.totalorder %s448_s25, %s448_s25 }
  0x2e   :  { %p455_p8 = por %p454_p7, %p453_p6 }
  0x30   :  { %p456_p9 = pnand %p455_p8, %p449_p5 }
  0x32   :  { %459 = shalt.err (!%p456_p9)
}
  0x33   :  { %49 = dma.hbm_to_vmem [thread:$0]  %s586_s3, 2048, %s44_s17, [#allocation6], %s492_s1, %s492_s1, %s493_s13  }
  0x34   :  { %482 = dma.done.wait [#allocation3], 256  }
  0x35   :  { %483 = vsyncadd [#allocation3], 4294967040 }
  0x36   :  { %484 = dma.done.wait [#allocation6], 2560  }
  0x37   :  { %485 = vsyncadd [#allocation6], 4294964736  ;;  %v495_v0 = vmov 0.0   ;;  %vm84_vm0 = vcmask 1043456   ;;  %vm496_vm1 = vmmov 1   ;;  %v62_v1 = vld [vmem:[#allocation5 + $0x8] sm:$0xff]  ;;  %v67_v33 = vlaneseq }
  0x38   :  { %155 = vmatprep.mubr.f32.mxu0 %v495_v0  ;;  %vm347_vm2 = vmpackc.low %vm84_vm0, %vm496_vm1  ;;  %v64_v2 = vld [vmem:[#allocation5 + $0x18] sm:$0xf]  ;;  %v61_v3 = vld [vmem:[#allocation5] sm:$0xff]  ;;  %vm77_vm3 = vcmask 97280  }
  0x39   :  { %v346_v4 = vpack.c.bf16 %v64_v2, %v62_v1  ;;  %v63_v5 = vld [vmem:[#allocation5 + $0x10] sm:$0xf]  ;;  %v172_v7 = vld [vmem:[#allocation7] sm:$0xff]  ;;  %v173_v8 = vld [vmem:[#allocation7 + $0x8] sm:$0xff]  ;;  %v68_v34 = vshrl.u32 %v67_v33, 7 }
  0x3a   :  { %v349_v6 = vpack.c.bf16 %v63_v5, %v61_v3  ;;  %v174_v9 = vld [vmem:[#allocation7 + $0x10] sm:$0xff]  ;;  %v352_v10 = vpack.c.bf16 %v173_v8, %v172_v7  ;;  %v175_v11 = vld [vmem:[#allocation7 + $0x18] sm:$0xff]  ;;  %v176_v14 = vld [vmem:[#allocation7 + $0x20] sm:$0xff] }
  0x3b   :  { %348 = vmatprep.subr.msk.bf16.mxu0 %vm347_vm2, %v346_v4  ;;  %v59_v12 = vld [vmem:[#allocation2] sm:$0xff]  ;;  %v356_v13 = vpack.c.bf16 %v175_v11, %v174_v9  ;;  %v177_v15 = vld [vmem:[#allocation7 + $0x28] sm:$0xff]  ;;  %v60_v17 = vld [vmem:[#allocation2 + $0x8] sm:$0xff]  ;;  %v69_v35 = vsub.s32 0, %v68_v34  ;;  %v73_v48 = vsub.s32 1, %v68_v34 }
  0x3c   :  { %351 = vmatpush1.bf16.msk.msra.mxu0 %vm347_vm2, %v349_v6  ;;  %353 = vmatprep.subr.bf16.mxu1 %v352_v10  ;;  %v360_v16 = vpack.c.bf16 %v177_v15, %v176_v14  ;;  %v178_v18 = vld [vmem:[#allocation7 + $0x30] sm:$0xff]  ;;  %v179_v19 = vld [vmem:[#allocation7 + $0x38] sm:$0xff]  ;;  %v180_v21 = vld [vmem:[#allocation7 + $0x40] sm:$0xff] }
  0x3d   :  { %355 = vmatpush3.bf16.msra.mxu1 %v352_v10  ;;  %v364_v20 = vpack.c.bf16 %v179_v19, %v178_v18  ;;  %v181_v22 = vld [vmem:[#allocation7 + $0x48] sm:$0xff]  ;;  %v182_v24 = vld [vmem:[#allocation7 + $0x50] sm:$0xff]  ;;  %v183_v25 = vld [vmem:[#allocation7 + $0x58] sm:$0xff] }
  0x3e   :  { %357 = vmatprep.subr.bf16.mxu1 %v356_v13  ;;  %v368_v23 = vpack.c.bf16 %v181_v22, %v180_v21  ;;  %v372_v26 = vpack.c.bf16 %v183_v25, %v182_v24  ;;  %v184_v27 = vld [vmem:[#allocation7 + $0x60] sm:$0xff]  ;;  %v185_v28 = vld [vmem:[#allocation7 + $0x68] sm:$0xff]  ;;  %v186_v30 = vld [vmem:[#allocation7 + $0x70] sm:$0xff] }
  0x3f   :  { %291 = vmatmul.mubr.msk.f32.vlgmr.msra.gmra.mrb[0].mxu0 %vm77_vm3, %v59_v12  ;;  %v376_v29 = vpack.c.bf16 %v185_v28, %v184_v27  ;;  %v187_v31 = vld [vmem:[#allocation7 + $0x78] sm:$0xff]  ;;  %v65_v36 = vld [vmem:[%s585_s2] sm:$0x3]  ;;  %s497_s2 = smov [#allocation8]  }
  0x40   :  { %161 = vmatprep.mubr.f32.mxu0 %v495_v0  ;;  %v380_v32 = vpack.c.bf16 %v187_v31, %v186_v30  ;;  %v70_v37 = vrot.slane %v65_v36, %v69_v35  ;;  %v74_v49 = vrot.slane %v65_v36, %v73_v48  ;;  %s276_s28 = sshll.u32 %s497_s2, 4  ;;  %s277_s28 = int_to_ptr.vmem [resolvable:$true] %s276_s28 }
  0x41   :  { %359 = vmatpush3.bf16.msra.mxu1 %v356_v13  ;;  %s460_s29 = scalar_lea.vmem %s277_s28, 256  ;;  %p465_p11 = scmp.lt.s32.totalorder %s277_s28, %s277_s28 }
  0x42   :  { %361 = vmatprep.subr.bf16.mxu1 %v360_v16  ;;  %p461_p10 = scmp.ne.s32.totalorder %s277_s28, %s460_s29  ;;  %p466_p12 = scmp.lt.s32.totalorder %s460_s29, %s460_s29 }
  0x43   :  { %292 = vmatmul.mubr.msk.f32.gmra.mrb[2].mxu0 %vm77_vm3, %v60_v17 }
  0x44   :  { %p467_p13 = por %p466_p12, %p465_p11 }
  0x45   :  { %363 = vmatpush3.bf16.msra.mxu1 %v360_v16 }
  0x46   :  { %365 = vmatprep.subr.bf16.mxu1 %v364_v20  ;;  %p468_p0 = pnand %p467_p13, %p461_p10 }
  0x49   :  { %367 = vmatpush3.bf16.msra.mxu1 %v364_v20 }
  0x4a   :  { %369 = vmatprep.subr.bf16.mxu1 %v368_v23 }
  0x4d   :  { %371 = vmatpush3.bf16.msra.mxu1 %v368_v23 }
  0x4e   :  { %373 = vmatprep.subr.bf16.mxu1 %v372_v26 }
  0x51   :  { %375 = vmatpush3.bf16.msra.mxu1 %v372_v26 }
  0x52   :  { %377 = vmatprep.subr.bf16.mxu1 %v376_v29 }
  0x55   :  { %379 = vmatpush3.bf16.msra.mxu1 %v376_v29 }
  0x56   :  { %381 = vmatprep.subr.bf16.mxu1 %v380_v32 }
  0x59   :  { %383 = vmatpush3.bf16.msra.mxu1 %v380_v32 }
 0x112   :  { %v157_v38 = vpop.f32.mrb[0].mxu0 }
 0x113   :  { %v158_v39 = vadd.f32 %v157_v38, %v70_v37  ;;  %v159_v40 = vpop.f32.mrb[1].mxu0 }
 0x114   :  { %v160_v51 = vadd.f32 %v159_v40, %v74_v49 }
 0x115   :  { %v168_v41 = vmul.f32 0.01, %v158_v39 }
 0x116   :  { %v163_v42 = vpop.f32.mrb[2].mxu0 }
 0x117   :  { %v164_v43 = vadd.f32 %v163_v42, %v70_v37  ;;  %v165_v44 = vpop.f32.mrb[3].mxu0  ;;  %v170_v45 = vmax.f32 %v158_v39, %v168_v41 }
 0x118   :  { %v166_v50 = vadd.f32 %v165_v44, %v74_v49 }
 0x119   :  { %v169_v46 = vmul.f32 0.01, %v164_v43  ;;  %343 = vmatprep.mubr.f32.mxu1 %v170_v45 }
 0x11b   :  { %v171_v47 = vmax.f32 %v164_v43, %v169_v46 }
 0x11d   :  { %344 = vmatmul.mubr.f32.vlgmr.msra.gmra.mrb[0].mxu1 %v171_v47 }
 0x1f0   :  { %v345_v52 = vpop.f32.mrb[0].mxu1 }
 0x1f1   :  { %v264_v53 = vadd.f32 %v345_v52, %v166_v50  ;;  %v254_v54 = vpop.f32.mrb[1].mxu1 }
 0x1f2   :  { %v263_v55 = vadd.f32 %v254_v54, %v160_v51 }
 0x1f3   :  { %v266_v56 = vmul.f32 0.01, %v264_v53 }
 0x1f4   :  { %v265_v57 = vmul.f32 0.01, %v263_v55 }
 0x1f5   :  { %v268_v58 = vmax.f32 %v264_v53, %v266_v56 }
 0x1f6   :  { %v267_v59 = vmax.f32 %v263_v55, %v265_v57 }
 0x1f7   :  { %270 = vst [vmem:[#allocation8 + $0x8] sm:$0xff] %v268_v58 }
 0x1f8   :  { %269 = vst [vmem:[#allocation8] sm:$0xff] %v267_v59 }
 0x1f9   :  { %471 = shalt.err (!%p468_p0)
}
 0x1fa   :  { %s472_s6 = scalar_lea.hbm %s587_s4, 256 }
 0x1fb   :  { %p473_p1 = scmp.ne.s32.totalorder %s587_s4, %s472_s6  ;;  %p476_p2 = scmp.lt.u32.totalorder %s472_s6, %s587_s4 }
 0x1fd   :  { %p478_p3 = pnand %p476_p2, %p473_p1 }
 0x1ff   :  { %481 = shalt.err (!%p478_p3)
}
 0x200   :  { %282 = dma.vmem_to_hbm [thread:$0]  %s277_s28, 256, %s587_s4, [#allocation4], %s492_s1, %s492_s1, %s493_s13  }
 0x201   :  { %486 = dma.done.wait [#allocation4], 256  }
 0x202   :  { %487 = vsyncadd [#allocation4], 4294967040 }
 0x203   :  { %286 = vsyncpa [#allocation3], 1 }
 0x204   :  { %287 = vsyncpa [#allocation6], 1 }
 0x205   :  { %288 = vsyncpa [#allocation4], 1 }

</bundles_post_ra>
